<compile_context>
chip_gen: v7x
topology: tpu7x:2x2x1
jax: 0.10.0
libtpu: 0.0.40
codegen_flags: <defaults>
</compile_context>

<pallas_src>
import numpy as np
import jax
import jax.numpy as jnp
from jax.experimental import pallas as pl
from jax.experimental.pallas import tpu as pltpu


def _round_up(x, m):
    return ((x + m - 1) // m) * m


def maxout_kernel(x_ref, w_ref, b_ref, o_ref):
    # x_ref: (tm, d_in)  w_ref: (pool, d_in, tn)  b_ref: (pool, 1, tn)
    # o_ref: (tm, tn)
    x = x_ref[...]                      # native dtype straight to the MXU
    pool = w_ref.shape[0]
    # Initialize the accumulator from pool slot 0 (saves a -inf broadcast and
    # one vector max per tile).
    acc = jnp.dot(x, w_ref[0], preferred_element_type=jnp.float32)
    acc = acc + b_ref[0].astype(jnp.float32)
    for p in range(1, pool):            # pool is small & static -> unrolled
        y = jnp.dot(x, w_ref[p], preferred_element_type=jnp.float32)
        y = y + b_ref[p].astype(jnp.float32)
        acc = jnp.maximum(acc, y)
    o_ref[...] = acc.astype(o_ref.dtype)


def maxout_forward(x, w_pooled, b_pooled, *, tm_max=256, tn_max=256):
    """x: (..., d_in); w_pooled: (pool, d_in, d_out); b_pooled: (pool, 1, d_out)."""
    orig_shape = x.shape
    d_in = orig_shape[-1]
    pool, _, d_out = w_pooled.shape
    M = int(np.prod(orig_shape[:-1]))
    x2 = x.reshape(M, d_in)

    # Lane-dense output tile: pad d_out to a multiple of 128.
    d_out_p = _round_up(d_out, 128)
    tn = min(tn_max, d_out_p)
    if d_out_p % tn != 0:
        tn = 128

    # M tile: multiple of 8 sublanes; pad M so tiles divide evenly.
    tm = min(tm_max, _round_up(M, 8))
    M_p = _round_up(M, tm)

    if M_p != M:
        x2 = jnp.pad(x2, ((0, M_p - M), (0, 0)))
    if d_out_p != d_out:
        w_pooled = jnp.pad(w_pooled, ((0, 0), (0, 0), (0, d_out_p - d_out)))
        b_pooled = jnp.pad(b_pooled, ((0, 0), (0, 0), (0, d_out_p - d_out)))

    n_n = d_out_p // tn
    n_m = M_p // tm

    elt = jnp.dtype(x.dtype).itemsize
    # Double-buffered resident-set estimate (+ headroom), clamped so it stays
    # valid on v7x's 64 MiB VMEM.
    vmem_needed = 2 * (tm * d_in * elt
                       + pool * d_in * tn * elt
                       + pool * tn * elt
                       + tm * tn * elt) + tm * tn * 4
    vmem_limit = int(min(64 * 1024 * 1024,
                         max(32 * 1024 * 1024, vmem_needed + 4 * 1024 * 1024)))

    cost = pl.CostEstimate(
        flops=2 * M_p * d_in * d_out_p * pool,
        transcendentals=0,
        bytes_accessed=(x2.size + w_pooled.size + b_pooled.size
                        + M_p * d_out_p) * elt,
    )

    # Grid = (N-tiles, M-tiles): M is the fastest-varying axis, so the weight /
    # bias block indices (which depend only on the N axis) repeat across
    # consecutive steps and Pallas skips their re-DMA.
    out = pl.pallas_call(
        maxout_kernel,
        out_shape=jax.ShapeDtypeStruct((M_p, d_out_p), x.dtype),
        grid_spec=pltpu.PrefetchScalarGridSpec(
            num_scalar_prefetch=0,
            grid=(n_n, n_m),
            in_specs=[
                pl.BlockSpec((tm, d_in), lambda j, i: (i, 0)),
                pl.BlockSpec((pool, d_in, tn), lambda j, i: (0, 0, j)),
                pl.BlockSpec((pool, 1, tn), lambda j, i: (0, 0, j)),
            ],
            out_specs=pl.BlockSpec((tm, tn), lambda j, i: (i, j)),
        ),
        compiler_params=pltpu.CompilerParams(
            dimension_semantics=("parallel", "parallel"),
            vmem_limit_bytes=vmem_limit,
        ),
        cost_estimate=cost,
    )(x2, w_pooled, b_pooled)

    out = out[:M, :d_out]
    return out.reshape(*orig_shape[:-1], d_out)


def init_maxout_params(key, d_in, d_out, pool_size, dtype=jnp.float32):
    """Deterministic init matching torch.nn.Linear's U(-1/sqrt(d_in), 1/sqrt(d_in))."""
    kw, kb = jax.random.split(key)
    bound = 1.0 / np.sqrt(d_in)
    # Equivalent of torch weight (d_out*pool, d_in), stored transposed: (d_in, d_out*pool)
    W = jax.random.uniform(kw, (d_in, d_out * pool_size), dtype,
                           minval=-bound, maxval=bound)
    b = jax.random.uniform(kb, (d_out * pool_size,), dtype,
                           minval=-bound, maxval=bound)
    # Rearrange so slot p holds columns j*pool + p  (matches .view(..., d_out, pool))
    w_pooled = W.reshape(d_in, d_out, pool_size).transpose(2, 0, 1)   # (pool, d_in, d_out)
    b_pooled = b.reshape(d_out, pool_size).T.reshape(pool_size, 1, d_out)
    return W, b, w_pooled, b_pooled


def maxout_reference(x, W, b, d_out, pool_size):
    y = x @ W + b
    y = y.reshape(*x.shape[:-1], d_out, pool_size)
    return jnp.max(y, axis=-1)


if __name__ == "__main__":
    d_in, d_out, pool_size = 32, 16, 4
    batch, seq = 2, 4  # arbitrary leading dims, like the torch module supports

    key = jax.random.PRNGKey(0)
    kx, kp = jax.random.split(key)
    x = jax.random.normal(kx, (batch, seq, d_in), dtype=jnp.float32)

    W, b, w_pooled, b_pooled = init_maxout_params(kp, d_in, d_out, pool_size)

    out = maxout_forward(x, w_pooled, b_pooled)
    out = jax.block_until_ready(out)

    ref = maxout_reference(x, W, b, d_out, pool_size)
    assert out.shape == (batch, seq, d_out), out.shape
    np.testing.assert_allclose(np.asarray(out), np.asarray(ref),
                               rtol=1e-5, atol=1e-5)
    print("KERNEL_OK")
</pallas_src>

<mosaic_0001>
module attributes {stable_mosaic.version = 11 : i64} {
  func.func @maxout_kernel(%arg0: i32, %arg1: i32, %arg2: memref<8x32xf32, #tpu.memory_space<vmem>>, %arg3: memref<4x32x128xf32, #tpu.memory_space<vmem>>, %arg4: memref<4x1x128xf32, #tpu.memory_space<vmem>>, %arg5: memref<8x128xf32, #tpu.memory_space<vmem>>) attributes {dimension_semantics = [#tpu.dimension_semantics<parallel>, #tpu.dimension_semantics<parallel>], iteration_bounds = array<i64: 1, 1>, scalar_prefetch = 0 : i64, scratch_operands = 0 : i64, tpu.core_type = #tpu.core_type<tc>, window_params = [{transform_indices = @transform_0, window_bounds = array<i64: 8, 32>}, {transform_indices = @transform_1, window_bounds = array<i64: 4, 32, 128>}, {transform_indices = @transform_2, window_bounds = array<i64: 4, 1, 128>}, {transform_indices = @transform_3, window_bounds = array<i64: 8, 128>}]} {
    %c0 = arith.constant 0 : index
    %c0_0 = arith.constant 0 : index
    %0 = vector.load %arg2[%c0, %c0_0] : memref<8x32xf32, #tpu.memory_space<vmem>>, vector<8x32xf32>
    %c0_1 = arith.constant 0 : index
    %c0_2 = arith.constant 0 : index
    %c0_3 = arith.constant 0 : index
    %1 = vector.load %arg3[%c0_1, %c0_2, %c0_3] : memref<4x32x128xf32, #tpu.memory_space<vmem>>, vector<1x32x128xf32>
    %2 = vector.shape_cast %1 : vector<1x32x128xf32> to vector<32x128xf32>
    %cst = arith.constant dense<0.000000e+00> : vector<8x128xf32>
    %3 = tpu.matmul %0, %2, %cst {dimension_numbers = #tpu.dot_dimension_numbers<[1], [0], [0], [1], [0, 0, 1, 1], [], []>} : vector<8x32xf32>, vector<32x128xf32>, vector<8x128xf32> -> vector<8x128xf32>
    %c0_4 = arith.constant 0 : index
    %c0_5 = arith.constant 0 : index
    %c0_6 = arith.constant 0 : index
    %4 = vector.load %arg4[%c0_4, %c0_5, %c0_6] : memref<4x1x128xf32, #tpu.memory_space<vmem>>, vector<1x1x128xf32>
    %5 = vector.shape_cast %4 : vector<1x1x128xf32> to vector<1x128xf32>
    %6 = vector.broadcast %5 : vector<1x128xf32> to vector<8x128xf32>
    %7 = arith.addf %3, %6 : vector<8x128xf32>
    %c1 = arith.constant 1 : index
    %c0_7 = arith.constant 0 : index
    %c0_8 = arith.constant 0 : index
    %8 = vector.load %arg3[%c1, %c0_7, %c0_8] : memref<4x32x128xf32, #tpu.memory_space<vmem>>, vector<1x32x128xf32>
    %9 = vector.shape_cast %8 : vector<1x32x128xf32> to vector<32x128xf32>
    %cst_9 = arith.constant dense<0.000000e+00> : vector<8x128xf32>
    %10 = tpu.matmul %0, %9, %cst_9 {dimension_numbers = #tpu.dot_dimension_numbers<[1], [0], [0], [1], [0, 0, 1, 1], [], []>} : vector<8x32xf32>, vector<32x128xf32>, vector<8x128xf32> -> vector<8x128xf32>
    %c1_10 = arith.constant 1 : index
    %c0_11 = arith.constant 0 : index
    %c0_12 = arith.constant 0 : index
    %11 = vector.load %arg4[%c1_10, %c0_11, %c0_12] : memref<4x1x128xf32, #tpu.memory_space<vmem>>, vector<1x1x128xf32>
    %12 = vector.shape_cast %11 : vector<1x1x128xf32> to vector<1x128xf32>
    %13 = vector.broadcast %12 : vector<1x128xf32> to vector<8x128xf32>
    %14 = arith.addf %10, %13 : vector<8x128xf32>
    %15 = arith.maximumf %7, %14 : vector<8x128xf32>
    %c2 = arith.constant 2 : index
    %c0_13 = arith.constant 0 : index
    %c0_14 = arith.constant 0 : index
    %16 = vector.load %arg3[%c2, %c0_13, %c0_14] : memref<4x32x128xf32, #tpu.memory_space<vmem>>, vector<1x32x128xf32>
    %17 = vector.shape_cast %16 : vector<1x32x128xf32> to vector<32x128xf32>
    %cst_15 = arith.constant dense<0.000000e+00> : vector<8x128xf32>
    %18 = tpu.matmul %0, %17, %cst_15 {dimension_numbers = #tpu.dot_dimension_numbers<[1], [0], [0], [1], [0, 0, 1, 1], [], []>} : vector<8x32xf32>, vector<32x128xf32>, vector<8x128xf32> -> vector<8x128xf32>
    %c2_16 = arith.constant 2 : index
    %c0_17 = arith.constant 0 : index
    %c0_18 = arith.constant 0 : index
    %19 = vector.load %arg4[%c2_16, %c0_17, %c0_18] : memref<4x1x128xf32, #tpu.memory_space<vmem>>, vector<1x1x128xf32>
    %20 = vector.shape_cast %19 : vector<1x1x128xf32> to vector<1x128xf32>
    %21 = vector.broadcast %20 : vector<1x128xf32> to vector<8x128xf32>
    %22 = arith.addf %18, %21 : vector<8x128xf32>
    %23 = arith.maximumf %15, %22 : vector<8x128xf32>
    %c3 = arith.constant 3 : index
    %c0_19 = arith.constant 0 : index
    %c0_20 = arith.constant 0 : index
    %24 = vector.load %arg3[%c3, %c0_19, %c0_20] : memref<4x32x128xf32, #tpu.memory_space<vmem>>, vector<1x32x128xf32>
    %25 = vector.shape_cast %24 : vector<1x32x128xf32> to vector<32x128xf32>
    %cst_21 = arith.constant dense<0.000000e+00> : vector<8x128xf32>
    %26 = tpu.matmul %0, %25, %cst_21 {dimension_numbers = #tpu.dot_dimension_numbers<[1], [0], [0], [1], [0, 0, 1, 1], [], []>} : vector<8x32xf32>, vector<32x128xf32>, vector<8x128xf32> -> vector<8x128xf32>
    %c3_22 = arith.constant 3 : index
    %c0_23 = arith.constant 0 : index
    %c0_24 = arith.constant 0 : index
    %27 = vector.load %arg4[%c3_22, %c0_23, %c0_24] : memref<4x1x128xf32, #tpu.memory_space<vmem>>, vector<1x1x128xf32>
    %28 = vector.shape_cast %27 : vector<1x1x128xf32> to vector<1x128xf32>
    %29 = vector.broadcast %28 : vector<1x128xf32> to vector<8x128xf32>
    %30 = arith.addf %26, %29 : vector<8x128xf32>
    %31 = arith.maximumf %23, %30 : vector<8x128xf32>
    %c0_25 = arith.constant 0 : index
    %c0_26 = arith.constant 0 : index
    %32 = vector.load %arg5[%c0_25, %c0_26] : memref<8x128xf32, #tpu.memory_space<vmem>>, vector<8x128xf32>
    tpu.vector_store %arg5[%c0_25, %c0_26], %31 {strides = array<i32>} : memref<8x128xf32, #tpu.memory_space<vmem>>, vector<8x128xf32>,
    return
  }
  func.func @transform_0(%arg0: i32, %arg1: i32) -> (i32, i32) {
    %c0_i32 = arith.constant 0 : i32
    %c0_i32_0 = arith.constant 0 : i32
    return %arg1, %c0_i32 : i32, i32
  }
  func.func @transform_1(%arg0: i32, %arg1: i32) -> (i32, i32, i32) {
    %c0_i32 = arith.constant 0 : i32
    %c0_i32_0 = arith.constant 0 : i32
    %c0_i32_1 = arith.constant 0 : i32
    return %c0_i32, %c0_i32_0, %arg0 : i32, i32, i32
  }
  func.func @transform_2(%arg0: i32, %arg1: i32) -> (i32, i32, i32) {
    %c0_i32 = arith.constant 0 : i32
    %c0_i32_0 = arith.constant 0 : i32
    %c0_i32_1 = arith.constant 0 : i32
    return %c0_i32, %c0_i32_0, %arg0 : i32, i32, i32
  }
  func.func @transform_3(%arg0: i32, %arg1: i32) -> (i32, i32) {
    %c0_i32 = arith.constant 0 : i32
    return %arg1, %arg0 : i32, i32
  }
}

</mosaic_0001>

<bundles_post_ra>
// kernel: tpu_custom_call.1
= control target key start
LH: loop header
LB: loop body
LE: loop exit
PB: predicated region body
PF: predicated region fallthrough
CT: control target
= control target key end

     0   :  { %8 = vsyncpa [#allocation3], 0  ;;  %s666_s0 = inlined_call_operand.hbm [shape: f32[8,32], index: 0, kind: input, shape index: {}]   ;;  %s667_s1 = inlined_call_operand.hbm [shape: f32[4,32,128], index: 1, kind: input, shape index: {}]   ;;  %s668_s2 = inlined_call_operand.vmem [shape: f32[4,1,128], index: 2, kind: input, shape index: {}]   ;;  %s669_s3 = inlined_call_operand.hbm [shape: f32[8,128], index: 3, kind: output, shape index: {}]  }
   0x1   :  { %9 = vsyncpa [#allocation6], 0 }
   0x2   :  { %10 = vsyncpa [#allocation4], 0  ;;  %s575_s12 = smov [#allocation2]   ;;  %s576_s14 = smov [#allocation5]  }
   0x3   :  { %s17_s13 = sshll.u32 %s575_s12, 4  ;;  %s26_s15 = sshll.u32 %s576_s14, 4  ;;  %s18_s13 = int_to_ptr.vmem [resolvable:$true] %s17_s13  ;;  %s603_s15 = int_to_ptr.vmem [resolvable:$true] %s26_s15 }
   0x4   :  { %s503_s18 = scalar_lea.hbm %s666_s0, 128 }
   0x5   :  { %p504_p0 = scmp.ne.s32.totalorder %s666_s0, %s503_s18  ;;  %p507_p1 = scmp.lt.u32.totalorder %s503_s18, %s666_s0 }
   0x7   :  { %p509_p2 = pnand %p507_p1, %p504_p0 }
   0x9   :  { %512 = shalt.err (!%p509_p2)
}
   0xa   :  { %s513_s23 = scalar_lea.vmem %s18_s13, 128  ;;  %p518_p4 = scmp.lt.s32.totalorder %s18_s13, %s18_s13 }
   0xb   :  { %p514_p3 = scmp.ne.s32.totalorder %s18_s13, %s513_s23  ;;  %p519_p5 = scmp.lt.s32.totalorder %s513_s23, %s513_s23 }
   0xd   :  { %p520_p6 = por %p519_p5, %p518_p4 }
   0xf   :  { %p521_p7 = pnand %p520_p6, %p514_p3 }
  0x11   :  { %524 = shalt.err (!%p521_p7)
}
  0x12   :  { %20 = dma.hbm_to_vmem [thread:$0]  %s666_s0, 128, %s18_s13, [#allocation3]  }
  0x13   :  { %s525_s28 = scalar_lea.hbm %s667_s1, 2048 }
  0x14   :  { %p526_p8 = scmp.ne.s32.totalorder %s667_s1, %s525_s28  ;;  %p529_p9 = scmp.lt.u32.totalorder %s525_s28, %s667_s1 }
  0x16   :  { %p531_p10 = pnand %p529_p9, %p526_p8 }
  0x18   :  { %534 = shalt.err (!%p531_p10)
}
  0x19   :  { %s535_s6 = scalar_lea.vmem %s603_s15, 2048  ;;  %p540_p12 = scmp.lt.s32.totalorder %s603_s15, %s603_s15 }
  0x1a   :  { %p536_p11 = scmp.ne.s32.totalorder %s603_s15, %s535_s6  ;;  %p541_p13 = scmp.lt.s32.totalorder %s535_s6, %s535_s6 }
  0x1c   :  { %p542_p0 = por %p541_p13, %p540_p12 }
  0x1e   :  { %p543_p1 = pnand %p542_p0, %p536_p11 }
  0x20   :  { %546 = shalt.err (!%p543_p1)
}
  0x21   :  { %s577_s0 = smov 128   ;;  %s578_s7 = smov 8  }
  0x22   :  { %32 = dma.hbm_to_vmem [thread:$0]  %s667_s1, 2048, %s603_s15, [#allocation6], %s577_s0, %s577_s0, %s578_s7  }
  0x23   :  { %569 = dma.done.wait [#allocation3], 128  }
  0x24   :  { %570 = vsyncadd [#allocation3], 4294967168 }
  0x25   :  { %571 = dma.done.wait [#allocation6], 2048  }
  0x26   :  { %572 = vsyncadd [#allocation6], 4294965248  ;;  %v579_v0 = vmov 0.0|0.0   ;;  %vm580_vm0 = vmmov 0   ;;  %v581_v1 = vmov 0.0   ;;  %v42_v2 = vld [vmem:[#allocation5] sm:$0xff] }
  0x27   :  { %471 = vmatprep.subr.bf16.mxu0 %v579_v0  ;;  %477 = vmatprep.subr.bf16.mxu1 %v579_v0  ;;  %v43_v3 = vld [vmem:[#allocation5 + $0x8] sm:$0xff]  ;;  %v128_v4 = vld [vmem:[#allocation5 + $0x20] sm:$0xff]  ;;  %v44_v7 = vld [vmem:[#allocation5 + $0x10] sm:$0xff]  ;;  %vm53_vm1 = vcmask 261120   ;;  %s582_s17 = smov [#allocation7]  }
  0x28   :  { %435 = vmatprep.mubr.msk.f32.mxu0 %vm580_vm0, %v581_v1  ;;  %446 = vmatprep.mubr.msk.f32.mxu1 %vm580_vm0, %v581_v1  ;;  %v472_v5 = vpack.c.bf16 %v43_v3, %v42_v2  ;;  %v129_v6 = vld [vmem:[#allocation5 + $0x28] sm:$0xff]  ;;  %v45_v8 = vld [vmem:[#allocation5 + $0x18] sm:$0xff]  ;;  %v130_v10 = vld [vmem:[#allocation5 + $0x30] sm:$0xff]  ;;  %s386_s18 = sshll.u32 %s582_s17, 4  ;;  %s387_s18 = int_to_ptr.vmem [resolvable:$true] %s386_s18 }
  0x29   :  { %v478_v9 = vpack.c.bf16 %v129_v6, %v128_v4  ;;  %v131_v11 = vld [vmem:[#allocation5 + $0x38] sm:$0xff]  ;;  %v475_v12 = vpack.c.bf16 %v45_v8, %v44_v7  ;;  %v212_v14 = vld [vmem:[#allocation5 + $0x40] sm:$0xff]  ;;  %v213_v15 = vld [vmem:[#allocation5 + $0x48] sm:$0xff]  ;;  %s547_s19 = scalar_lea.vmem %s387_s18, 128  ;;  %p552_p3 = scmp.lt.s32.totalorder %s387_s18, %s387_s18 }
  0x2a   :  { %473 = vmatpush3.bf16.msra.mxu0 %v472_v5  ;;  %v481_v13 = vpack.c.bf16 %v131_v11, %v130_v10  ;;  %v296_v16 = vld [vmem:[#allocation5 + $0x60] sm:$0xff]  ;;  %v297_v17 = vld [vmem:[#allocation5 + $0x68] sm:$0xff]  ;;  %v41_v18 = vld [vmem:[#allocation2] sm:$0xff]  ;;  %v484_v19 = vpack.c.bf16 %v213_v15, %v212_v14  ;;  %p548_p2 = scmp.ne.s32.totalorder %s387_s18, %s547_s19  ;;  %p553_p4 = scmp.lt.s32.totalorder %s547_s19, %s547_s19 }
  0x2b   :  { %479 = vmatpush3.bf16.msra.mxu1 %v478_v9  ;;  %474 = vmatprep.subr.bf16.mxu0 %v579_v0  ;;  %v490_v20 = vpack.c.bf16 %v297_v17, %v296_v16  ;;  %v214_v21 = vld [vmem:[#allocation5 + $0x50] sm:$0xff]  ;;  %v215_v22 = vld [vmem:[#allocation5 + $0x58] sm:$0xff] }
  0x2c   :  { %480 = vmatprep.subr.bf16.mxu1 %v579_v0  ;;  %v298_v23 = vld [vmem:[#allocation5 + $0x70] sm:$0xff]  ;;  %v299_v24 = vld [vmem:[#allocation5 + $0x78] sm:$0xff]  ;;  %v487_v25 = vpack.c.bf16 %v215_v22, %v214_v21  ;;  %p554_p5 = por %p553_p4, %p552_p3 }
  0x2d   :  { %v493_v26 = vpack.c.bf16 %v299_v24, %v298_v23  ;;  %v396_v27 = vld [vmem:[%s668_s2] ss:$0 sm:$0xff]  ;;  %v399_v28 = vld [vmem:[%s668_s2 + $0x1] ss:$0 sm:$0xff]  ;;  %v402_v36 = vld [vmem:[%s668_s2 + $0x2] ss:$0 sm:$0xff] }
  0x2e   :  { %476 = vmatpush3.bf16.msra.mxu0 %v475_v12  ;;  %v405_v37 = vld [vmem:[%s668_s2 + $0x3] ss:$0 sm:$0xff]  ;;  %p555_p6 = pnand %p554_p5, %p548_p2 }
  0x2f   :  { %482 = vmatpush3.bf16.msra.mxu1 %v481_v13  ;;  %483 = vmatprep.subr.bf16.mxu0 %v579_v0 }
  0x30   :  { %489 = vmatprep.subr.bf16.mxu1 %v579_v0 }
  0x31   :  { %436 = vmatmul.mubr.msk.f32.vlgmr.msra.gmra.mrb[0].mxu0 %vm53_vm1, %v41_v18 }
  0x32   :  { %447 = vmatmul.mubr.msk.f32.vlgmr.msra.gmra.mrb[0].mxu1 %vm53_vm1, %v41_v18  ;;  %485 = vmatpush3.bf16.msra.mxu0 %v484_v19 }
  0x33   :  { %491 = vmatpush3.bf16.msra.mxu1 %v490_v20  ;;  %486 = vmatprep.subr.bf16.mxu0 %v579_v0 }
  0x34   :  { %492 = vmatprep.subr.bf16.mxu1 %v579_v0  ;;  %457 = vmatprep.mubr.msk.f32.mxu0 %vm580_vm0, %v581_v1 }
  0x35   :  { %468 = vmatprep.mubr.msk.f32.mxu1 %vm580_vm0, %v581_v1 }
  0x36   :  { %488 = vmatpush3.bf16.msra.mxu0 %v487_v25 }
  0x37   :  { %494 = vmatpush3.bf16.msra.mxu1 %v493_v26 }
  0x39   :  { %458 = vmatmul.mubr.msk.f32.vlgmr.msra.gmra.mrb[2].mxu0 %vm53_vm1, %v41_v18 }
  0x3a   :  { %469 = vmatmul.mubr.msk.f32.vlgmr.msra.gmra.mrb[2].mxu1 %vm53_vm1, %v41_v18 }
 0x104   :  { %v123_v29 = vpop.f32.mrb[0].mxu0 }
 0x105   :  { %v124_v30 = vadd.f32 %v396_v27, %v123_v29  ;;  %v437_v31 = vpop.f32.mrb[1].mxu0  ;;  %v206_v32 = vpop.f32.mrb[0].mxu1 }
 0x106   :  { %v207_v33 = vadd.f32 %v399_v28, %v206_v32  ;;  %v448_v34 = vpop.f32.mrb[1].mxu1 }
 0x108   :  { %v210_v35 = vmax.f32 %v124_v30, %v207_v33 }
 0x10c   :  { %v290_v38 = vpop.f32.mrb[2].mxu0 }
 0x10d   :  { %v291_v39 = vadd.f32 %v402_v36, %v290_v38  ;;  %v459_v40 = vpop.f32.mrb[3].mxu0  ;;  %v374_v41 = vpop.f32.mrb[2].mxu1 }
 0x10e   :  { %v375_v42 = vadd.f32 %v405_v37, %v374_v41  ;;  %v470_v43 = vpop.f32.mrb[3].mxu1 }
 0x10f   :  { %v294_v44 = vmax.f32 %v210_v35, %v291_v39 }
 0x111   :  { %v378_v45 = vmax.f32 %v294_v44, %v375_v42 }
 0x113   :  { %379 = vst [vmem:[#allocation7] sm:$0xff] %v378_v45 }
 0x114   :  { %558 = shalt.err (!%p555_p6)
}
 0x115   :  { %s559_s21 = scalar_lea.hbm %s669_s3, 128 }
 0x116   :  { %p560_p7 = scmp.ne.s32.totalorder %s669_s3, %s559_s21  ;;  %p563_p8 = scmp.lt.u32.totalorder %s559_s21, %s669_s3 }
 0x118   :  { %p565_p9 = pnand %p563_p8, %p560_p7 }
 0x11a   :  { %568 = shalt.err (!%p565_p9)
}
 0x11b   :  { %389 = dma.vmem_to_hbm [thread:$0]  %s387_s18, 128, %s669_s3, [#allocation4]  }
 0x11c   :  { %573 = dma.done.wait [#allocation4], 128  }
 0x11d   :  { %574 = vsyncadd [#allocation4], 4294967168 }
 0x11e   :  { %393 = vsyncpa [#allocation3], 1 }
 0x11f   :  { %394 = vsyncpa [#allocation6], 1 }
 0x120   :  { %395 = vsyncpa [#allocation4], 1 }

</bundles_post_ra>
